<compile_context>
chip_gen: v7x
topology: tpu7x:2x2x1
jax: 0.10.0
libtpu: 0.0.40
codegen_flags: <defaults>
</compile_context>

<pallas_src>
import jax
import jax.numpy as jnp
from jax.experimental import pallas as pl
from jax.experimental.pallas import tpu as pltpu


_TARGET_TILE_BYTES = 4 * 1024 * 1024  # per-input VMEM tile target


def _round_up(a, m):
    return ((a + m - 1) // m) * m


def _make_kernel(*, hw_valid, tile_r, lane_w, steps_per_half, groups):
    """Kernel closed over static tiling constants."""

    def kernel(x_ref, t_ref, out_ref, acc_xt_ref, acc_xpt_ref):
        h = pl.program_id(1)          # core-split half
        s = pl.program_id(2)          # row-tile step within the half

        @pl.when(s == 0)
        def _init():
            acc_xt_ref[...] = jnp.zeros(acc_xt_ref.shape, acc_xt_ref.dtype)
            acc_xpt_ref[...] = jnp.zeros(acc_xpt_ref.shape, acc_xpt_ref.dtype)

        # Load each ref exactly once; all math in f32 (inputs may be bf16/fp16).
        x = jax.nn.sigmoid(x_ref[...].astype(jnp.float32))
        t = t_ref[...].astype(jnp.float32)

        # Logical (unclamped) position of this tile in the flattened channel-0 plane.
        row_start = (h * steps_per_half + s) * tile_r
        tile_is_full = (row_start + tile_r) * lane_w <= hw_valid

        def _accumulate(xv, tv):
            xt = xv * tv
            xpt = xv + tv
            if groups > 1:
                # Sublane fold: tile-aligned re-view + pure VPU adds, so the
                # resident accumulators stay tiny ((8, lane_w)).
                xt = jnp.sum(xt.reshape(groups, 8, lane_w), axis=0)
                xpt = jnp.sum(xpt.reshape(groups, 8, lane_w), axis=0)
            acc_xt_ref[...] += xt
            acc_xpt_ref[...] += xpt

        # Fast path: interior tile, no masking work at all.
        @pl.when(tile_is_full)
        def _fast():
            _accumulate(x, t)

        # Ragged tail (and fully-out-of-range clamped duplicates): mask by the
        # global flat index, so padded lanes / OOB rows / duplicated tiles all
        # contribute exactly zero regardless of what the DMA read.
        @pl.when(jnp.logical_not(tile_is_full))
        def _tail():
            rowi = jax.lax.broadcasted_iota(jnp.int32, (tile_r, lane_w), 0)
            lanei = jax.lax.broadcasted_iota(jnp.int32, (tile_r, lane_w), 1)
            flat = (row_start + rowi) * lane_w + lanei
            valid = flat < hw_valid
            _accumulate(jnp.where(valid, x, 0.0), jnp.where(valid, t, 0.0))

        @pl.when(s == steps_per_half - 1)
        def _finalize():
            inter = jnp.sum(acc_xt_ref[...])
            sum_xpt = jnp.sum(acc_xpt_ref[...])
            rowo = jax.lax.broadcasted_iota(jnp.int32, (8, 128), 0)
            laneo = jax.lax.broadcasted_iota(jnp.int32, (8, 128), 1)
            vals = jnp.where((rowo == 0) & (laneo == 0), inter, 0.0)
            vals = jnp.where((rowo == 0) & (laneo == 1), sum_xpt, vals)
            out_ref[...] = vals.astype(out_ref.dtype)

    return kernel


def dice_loss(inputs, targets, smooth=1.0):
    """Matches DiceLoss.forward(inputs, targets, smooth) from PyTorch
    (sigmoid -> channel-0 slice -> global dice)."""
    n, c, hgt, wdt = inputs.shape
    assert targets.shape == inputs.shape
    hw = hgt * wdt

    x3 = inputs.reshape(n, c, hw)
    t3 = targets.reshape(n, c, hw)

    if hw % 128 != 0:
        # Ragged spatial size: slice channel 0 FIRST so the (unavoidable) pad
        # copy touches only 1/c of the data; pad with zeros and let the
        # in-kernel mask drop the tail.
        x3 = x3[:, 0:1, :]
        t3 = t3[:, 0:1, :]
        hw_p = _round_up(hw, 128)
        pad = hw_p - hw
        x3 = jnp.pad(x3, ((0, 0), (0, 0), (0, pad)))
        t3 = jnp.pad(t3, ((0, 0), (0, 0), (0, pad)))
    else:
        hw_p = hw  # free reshape only; BlockSpec pins channel 0, no HBM copy.

    c_eff = x3.shape[1]

    # Lane-dense last dim.
    lane_w = next(l for l in (1024, 512, 256, 128) if hw_p % l == 0)
    r = hw_p // lane_w

    # Row-tile size: multiple of 16 (bf16-friendly), capped at ~4 MiB/input,
    # but small enough to give both cores work and keep the pipeline busy.
    itemsize = max(jnp.dtype(inputs.dtype).itemsize,
                   jnp.dtype(targets.dtype).itemsize)
    target_rows = max(16, (_TARGET_TILE_BYTES // (lane_w * max(itemsize, 4))) // 16 * 16)
    if r <= 16:
        tile_r = r  # full-extent block (allowed for any r)
    else:
        tile_r = min(target_rows, max(16, _round_up(pl.cdiv(r, 4), 16)))

    num_tiles = pl.cdiv(r, tile_r)
    n_split = 2 if num_tiles >= 2 else 1   # explicit 2-TC split of the row axis (v7x)
    steps = pl.cdiv(num_tiles, n_split)

    groups = tile_r // 8 if tile_r % 8 == 0 else 1
    acc_rows = 8 if tile_r % 8 == 0 else tile_r

    x4 = x3.reshape(n, c_eff, r, lane_w)
    t4 = t3.reshape(n, c_eff, r, lane_w)

    def in_index_map(b, h, s):
        # Clamp so the duplicated tail tile of an odd split still DMAs valid
        # data; its contribution is zeroed by the in-kernel mask.
        return (b, 0, jnp.minimum(h * steps + s, num_tiles - 1), 0)

    kernel = _make_kernel(hw_valid=hw, tile_r=tile_r, lane_w=lane_w,
                          steps_per_half=steps, groups=groups)

    partials = pl.pallas_call(
        kernel,
        out_shape=jax.ShapeDtypeStruct((n, n_split, 8, 128), jnp.float32),
        grid=(n, n_split, steps),
        in_specs=[
            pl.BlockSpec((None, None, tile_r, lane_w), in_index_map),
            pl.BlockSpec((None, None, tile_r, lane_w), in_index_map),
        ],
        out_specs=pl.BlockSpec((None, None, 8, 128), lambda b, h, s: (b, h, 0, 0)),
        scratch_shapes=[
            pltpu.VMEM((acc_rows, lane_w), jnp.float32),  # acc for x*t
            pltpu.VMEM((acc_rows, lane_w), jnp.float32),  # acc for x+t
        ],
        compiler_params=pltpu.CompilerParams(
            dimension_semantics=("parallel", "parallel", "arbitrary"),
            vmem_limit_bytes=40 * 1024 * 1024,
        ),
    )(x4, t4)

    inter = jnp.sum(partials[:, :, 0, 0])
    sum_x_plus_t = jnp.sum(partials[:, :, 0, 1])
    dice = (2.0 * inter + smooth) / (sum_x_plus_t + smooth)
    return (1.0 - dice).astype(jnp.float32)


def _ref_dice(x, t, smooth=1.0):
    xi = jax.nn.sigmoid(x.astype(jnp.float32))[:, 0].reshape(-1)
    ti = t.astype(jnp.float32)[:, 0].reshape(-1)
    inter = jnp.sum(xi * ti)
    return 1.0 - (2.0 * inter + smooth) / (jnp.sum(xi) + jnp.sum(ti) + smooth)


if __name__ == "__main__":
    key = jax.random.PRNGKey(0)
    k_x, k_t = jax.random.split(key)

    # Primary small NCHW case (128-aligned HW, fast path).
    x = jax.random.normal(k_x, (2, 4, 16, 16), dtype=jnp.float32)
    t = jax.random.bernoulli(k_t, p=0.5, shape=(2, 4, 16, 16)).astype(jnp.float32)
    loss = jax.block_until_ready(dice_loss(x, t, smooth=1.0))
    ref = _ref_dice(x, t, smooth=1.0)
    assert jnp.allclose(loss, ref, atol=1e-5), (loss, ref)

    # Ragged HW (hw % 128 != 0) exercises the channel-slice + in-kernel mask path.
    x2 = jax.random.normal(k_x, (1, 3, 10, 13), dtype=jnp.float32)
    t2 = jax.random.bernoulli(k_t, p=0.5, shape=(1, 3, 10, 13)).astype(jnp.float32)
    loss2 = jax.block_until_ready(dice_loss(x2, t2, smooth=1.0))
    ref2 = _ref_dice(x2, t2, smooth=1.0)
    assert jnp.allclose(loss2, ref2, atol=1e-5), (loss2, ref2)

    # Multiple row tiles + 2-way core split + partial last tile.
    x3 = jax.random.normal(k_x, (1, 1, 144, 128), dtype=jnp.float32)
    t3 = jax.random.bernoulli(k_t, p=0.5, shape=(1, 1, 144, 128)).astype(jnp.float32)
    loss3 = jax.block_until_ready(dice_loss(x3, t3, smooth=1.0))
    ref3 = _ref_dice(x3, t3, smooth=1.0)
    assert jnp.allclose(loss3, ref3, atol=1e-5), (loss3, ref3)

    print("KERNEL_OK")
</pallas_src>

<mosaic_0001>
module attributes {stable_mosaic.version = 11 : i64} {
  func.func @kernel(%arg0: i32, %arg1: i32, %arg2: i32, %arg3: memref<1x1x1x256xf32, #tpu.memory_space<vmem>>, %arg4: memref<1x1x1x256xf32, #tpu.memory_space<vmem>>, %arg5: memref<1x1x8x128xf32, #tpu.memory_space<vmem>>, %arg6: memref<1x256xf32, #tpu.memory_space<vmem>>, %arg7: memref<1x256xf32, #tpu.memory_space<vmem>>) attributes {dimension_semantics = [#tpu.dimension_semantics<parallel>, #tpu.dimension_semantics<parallel>, #tpu.dimension_semantics<arbitrary>], iteration_bounds = array<i64: 2, 1, 1>, scalar_prefetch = 0 : i64, scratch_operands = 2 : i64, tpu.core_type = #tpu.core_type<tc>, window_params = [{transform_indices = @transform_0, window_bounds = array<i64: 1, 1, 1, 256>}, {transform_indices = @transform_1, window_bounds = array<i64: 1, 1, 1, 256>}, {transform_indices = @transform_2, window_bounds = array<i64: 1, 1, 8, 128>}]} {
    %c0_i32 = arith.constant 0 : i32
    %0 = arith.cmpi eq, %arg2, %c0_i32 : i32
    %1 = arith.extui %0 : i1 to i32
    %c0_i32_0 = arith.constant 0 : i32
    %2 = arith.cmpi ne, %1, %c0_i32_0 : i32
    scf.if %2 {
      %cst_15 = arith.constant 0.000000e+00 : f32
      %26 = vector.broadcast %cst_15 : f32 to vector<1x256xf32>
      %c0_16 = arith.constant 0 : index
      %c0_17 = arith.constant 0 : index
      %27 = vector.load %arg6[%c0_16, %c0_17] : memref<1x256xf32, #tpu.memory_space<vmem>>, vector<1x256xf32>
      tpu.vector_store %arg6[%c0_16, %c0_17], %26 {strides = array<i32>} : memref<1x256xf32, #tpu.memory_space<vmem>>, vector<1x256xf32>,
      %cst_18 = arith.constant 0.000000e+00 : f32
      %28 = vector.broadcast %cst_18 : f32 to vector<1x256xf32>
      %c0_19 = arith.constant 0 : index
      %c0_20 = arith.constant 0 : index
      %29 = vector.load %arg7[%c0_19, %c0_20] : memref<1x256xf32, #tpu.memory_space<vmem>>, vector<1x256xf32>
      tpu.vector_store %arg7[%c0_19, %c0_20], %28 {strides = array<i32>} : memref<1x256xf32, #tpu.memory_space<vmem>>, vector<1x256xf32>,
    } else {
    }
    %c0 = arith.constant 0 : index
    %c0_1 = arith.constant 0 : index
    %c0_2 = arith.constant 0 : index
    %c0_3 = arith.constant 0 : index
    %3 = vector.load %arg3[%c0, %c0_1, %c0_2, %c0_3] : memref<1x1x1x256xf32, #tpu.memory_space<vmem>>, vector<1x1x1x256xf32>
    %4 = vector.shape_cast %3 : vector<1x1x1x256xf32> to vector<1x256xf32>
    %5 = arith.negf %4 : vector<1x256xf32>
    %6 = math.exp %5 : vector<1x256xf32>
    %cst = arith.constant 1.000000e+00 : f32
    %7 = vector.broadcast %cst : f32 to vector<1x256xf32>
    %8 = arith.addf %7, %6 : vector<1x256xf32>
    %9 = arith.divf %7, %8 : vector<1x256xf32>
    %c0_4 = arith.constant 0 : index
    %c0_5 = arith.constant 0 : index
    %c0_6 = arith.constant 0 : index
    %c0_7 = arith.constant 0 : index
    %10 = vector.load %arg4[%c0_4, %c0_5, %c0_6, %c0_7] : memref<1x1x1x256xf32, #tpu.memory_space<vmem>>, vector<1x1x1x256xf32>
    %11 = vector.shape_cast %10 : vector<1x1x1x256xf32> to vector<1x256xf32>
    %c1_i32 = arith.constant 1 : i32
    %12 = arith.muli %arg1, %c1_i32 : i32
    %13 = arith.addi %12, %arg2 : i32
    %c1_i32_8 = arith.constant 1 : i32
    %14 = arith.muli %13, %c1_i32_8 : i32
    %c1_i32_9 = arith.constant 1 : i32
    %15 = arith.addi %14, %c1_i32_9 : i32
    %c256_i32 = arith.constant 256 : i32
    %16 = arith.muli %15, %c256_i32 : i32
    %c256_i32_10 = arith.constant 256 : i32
    %17 = arith.cmpi sle, %16, %c256_i32_10 : i32
    %18 = arith.extui %17 : i1 to i32
    %c0_i32_11 = arith.constant 0 : i32
    %19 = arith.cmpi ne, %18, %c0_i32_11 : i32
    scf.if %19 {
      %26 = arith.mulf %9, %11 : vector<1x256xf32>
      %27 = arith.addf %9, %11 : vector<1x256xf32>
      %c0_15 = arith.constant 0 : index
      %c0_16 = arith.constant 0 : index
      %28 = vector.load %arg6[%c0_15, %c0_16] : memref<1x256xf32, #tpu.memory_space<vmem>>, vector<1x256xf32>
      %29 = arith.addf %28, %26 : vector<1x256xf32>
      %c0_17 = arith.constant 0 : index
      %c0_18 = arith.constant 0 : index
      %30 = vector.load %arg6[%c0_17, %c0_18] : memref<1x256xf32, #tpu.memory_space<vmem>>, vector<1x256xf32>
      tpu.vector_store %arg6[%c0_17, %c0_18], %29 {strides = array<i32>} : memref<1x256xf32, #tpu.memory_space<vmem>>, vector<1x256xf32>,
      %c0_19 = arith.constant 0 : index
      %c0_20 = arith.constant 0 : index
      %31 = vector.load %arg7[%c0_19, %c0_20] : memref<1x256xf32, #tpu.memory_space<vmem>>, vector<1x256xf32>
      %32 = arith.addf %31, %27 : vector<1x256xf32>
      %c0_21 = arith.constant 0 : index
      %c0_22 = arith.constant 0 : index
      %33 = vector.load %arg7[%c0_21, %c0_22] : memref<1x256xf32, #tpu.memory_space<vmem>>, vector<1x256xf32>
      tpu.vector_store %arg7[%c0_21, %c0_22], %32 {strides = array<i32>} : memref<1x256xf32, #tpu.memory_space<vmem>>, vector<1x256xf32>,
    } else {
    }
    %true = arith.constant true
    %20 = arith.xori %17, %true : i1
    %21 = arith.extui %20 : i1 to i32
    %c0_i32_12 = arith.constant 0 : i32
    %22 = arith.cmpi ne, %21, %c0_i32_12 : i32
    scf.if %22 {
      %26 = tpu.iota {dimensions = array<i32: 0>} : vector<1x256xi32>
      %27 = tpu.iota {dimensions = array<i32: 1>} : vector<1x256xi32>
      %28 = vector.broadcast %14 : i32 to vector<1x256xi32>
      %29 = arith.addi %28, %26 : vector<1x256xi32>
      %c256_i32_15 = arith.constant 256 : i32
      %30 = vector.broadcast %c256_i32_15 : i32 to vector<1x256xi32>
      %31 = arith.muli %29, %30 : vector<1x256xi32>
      %32 = arith.addi %31, %27 : vector<1x256xi32>
      %c256_i32_16 = arith.constant 256 : i32
      %33 = vector.broadcast %c256_i32_16 : i32 to vector<1x256xi32>
      %34 = arith.cmpi slt, %32, %33 : vector<1x256xi32>
      %cst_17 = arith.constant 0.000000e+00 : f32
      %35 = vector.broadcast %cst_17 : f32 to vector<1x256xf32>
      %36 = arith.select %34, %9, %35 : vector<1x256xi1>, vector<1x256xf32>
      %cst_18 = arith.constant 0.000000e+00 : f32
      %37 = vector.broadcast %cst_18 : f32 to vector<1x256xf32>
      %38 = arith.select %34, %11, %37 : vector<1x256xi1>, vector<1x256xf32>
      %39 = arith.mulf %36, %38 : vector<1x256xf32>
      %40 = arith.addf %36, %38 : vector<1x256xf32>
      %c0_19 = arith.constant 0 : index
      %c0_20 = arith.constant 0 : index
      %41 = vector.load %arg6[%c0_19, %c0_20] : memref<1x256xf32, #tpu.memory_space<vmem>>, vector<1x256xf32>
      %42 = arith.addf %41, %39 : vector<1x256xf32>
      %c0_21 = arith.constant 0 : index
      %c0_22 = arith.constant 0 : index
      %43 = vector.load %arg6[%c0_21, %c0_22] : memref<1x256xf32, #tpu.memory_space<vmem>>, vector<1x256xf32>
      tpu.vector_store %arg6[%c0_21, %c0_22], %42 {strides = array<i32>} : memref<1x256xf32, #tpu.memory_space<vmem>>, vector<1x256xf32>,
      %c0_23 = arith.constant 0 : index
      %c0_24 = arith.constant 0 : index
      %44 = vector.load %arg7[%c0_23, %c0_24] : memref<1x256xf32, #tpu.memory_space<vmem>>, vector<1x256xf32>
      %45 = arith.addf %44, %40 : vector<1x256xf32>
      %c0_25 = arith.constant 0 : index
      %c0_26 = arith.constant 0 : index
      %46 = vector.load %arg7[%c0_25, %c0_26] : memref<1x256xf32, #tpu.memory_space<vmem>>, vector<1x256xf32>
      tpu.vector_store %arg7[%c0_25, %c0_26], %45 {strides = array<i32>} : memref<1x256xf32, #tpu.memory_space<vmem>>, vector<1x256xf32>,
    } else {
    }
    %c0_i32_13 = arith.constant 0 : i32
    %23 = arith.cmpi eq, %arg2, %c0_i32_13 : i32
    %24 = arith.extui %23 : i1 to i32
    %c0_i32_14 = arith.constant 0 : i32
    %25 = arith.cmpi ne, %24, %c0_i32_14 : i32
    scf.if %25 {
      %c0_15 = arith.constant 0 : index
      %c0_16 = arith.constant 0 : index
      %26 = vector.load %arg6[%c0_15, %c0_16] : memref<1x256xf32, #tpu.memory_space<vmem>>, vector<1x256xf32>
      %27 = vector.shape_cast %26 : vector<1x256xf32> to vector<1x1x256xf32>
      %cst_17 = arith.constant dense<0.000000e+00> : vector<1xf32>
      %28 = vector.multi_reduction <add>, %27, %cst_17 [1, 2] : vector<1x1x256xf32> to vector<1xf32>
      %29 = vector.shape_cast %28 : vector<1xf32> to vector<1x1x1xf32>
      %30 = vector.extract %29[0, 0, 0] : f32 from vector<1x1x1xf32>
      %c0_18 = arith.constant 0 : index
      %c0_19 = arith.constant 0 : index
      %31 = vector.load %arg7[%c0_18, %c0_19] : memref<1x256xf32, #tpu.memory_space<vmem>>, vector<1x256xf32>
      %32 = vector.shape_cast %31 : vector<1x256xf32> to vector<1x1x256xf32>
      %cst_20 = arith.constant dense<0.000000e+00> : vector<1xf32>
      %33 = vector.multi_reduction <add>, %32, %cst_20 [1, 2] : vector<1x1x256xf32> to vector<1xf32>
      %34 = vector.shape_cast %33 : vector<1xf32> to vector<1x1x1xf32>
      %35 = vector.extract %34[0, 0, 0] : f32 from vector<1x1x1xf32>
      %36 = tpu.iota {dimensions = array<i32: 0>} : vector<8x128xi32>
      %37 = tpu.iota {dimensions = array<i32: 1>} : vector<8x128xi32>
      %c0_i32_21 = arith.constant 0 : i32
      %38 = vector.broadcast %c0_i32_21 : i32 to vector<8x128xi32>
      %39 = arith.cmpi eq, %36, %38 : vector<8x128xi32>
      %c0_i32_22 = arith.constant 0 : i32
      %40 = vector.broadcast %c0_i32_22 : i32 to vector<8x128xi32>
      %41 = arith.cmpi eq, %37, %40 : vector<8x128xi32>
      %42 = arith.andi %39, %41 : vector<8x128xi1>
      %cst_23 = arith.constant 0.000000e+00 : f32
      %43 = vector.broadcast %30 : f32 to vector<8x128xf32>
      %44 = vector.broadcast %cst_23 : f32 to vector<8x128xf32>
      %45 = arith.select %42, %43, %44 : vector<8x128xi1>, vector<8x128xf32>
      %c0_i32_24 = arith.constant 0 : i32
      %46 = vector.broadcast %c0_i32_24 : i32 to vector<8x128xi32>
      %47 = arith.cmpi eq, %36, %46 : vector<8x128xi32>
      %c1_i32_25 = arith.constant 1 : i32
      %48 = vector.broadcast %c1_i32_25 : i32 to vector<8x128xi32>
      %49 = arith.cmpi eq, %37, %48 : vector<8x128xi32>
      %50 = arith.andi %47, %49 : vector<8x128xi1>
      %51 = vector.broadcast %35 : f32 to vector<8x128xf32>
      %52 = arith.select %50, %51, %45 : vector<8x128xi1>, vector<8x128xf32>
      %c0_26 = arith.constant 0 : index
      %c0_27 = arith.constant 0 : index
      %c0_28 = arith.constant 0 : index
      %c0_29 = arith.constant 0 : index
      %53 = vector.load %arg5[%c0_26, %c0_27, %c0_28, %c0_29] : memref<1x1x8x128xf32, #tpu.memory_space<vmem>>, vector<1x1x8x128xf32>
      %54 = vector.shape_cast %53 : vector<1x1x8x128xf32> to vector<8x128xf32>
      %55 = vector.shape_cast %52 : vector<8x128xf32> to vector<1x1x8x128xf32>
      tpu.vector_store %arg5[%c0_26, %c0_27, %c0_28, %c0_29], %55 {strides = array<i32>} : memref<1x1x8x128xf32, #tpu.memory_space<vmem>>, vector<1x1x8x128xf32>,
    } else {
    }
    return
  }
  func.func @transform_0(%arg0: i32, %arg1: i32, %arg2: i32) -> (i32, i32, i32, i32) {
    %c1_i32 = arith.constant 1 : i32
    %0 = arith.muli %arg1, %c1_i32 : i32
    %1 = arith.addi %0, %arg2 : i32
    %c0_i32 = arith.constant 0 : i32
    %2 = arith.minsi %1, %c0_i32 : i32
    %c0_i32_0 = arith.constant 0 : i32
    %c0_i32_1 = arith.constant 0 : i32
    %c0_i32_2 = arith.constant 0 : i32
    return %arg0, %c0_i32_0, %2, %c0_i32_1 : i32, i32, i32, i32
  }
  func.func @transform_1(%arg0: i32, %arg1: i32, %arg2: i32) -> (i32, i32, i32, i32) {
    %c1_i32 = arith.constant 1 : i32
    %0 = arith.muli %arg1, %c1_i32 : i32
    %1 = arith.addi %0, %arg2 : i32
    %c0_i32 = arith.constant 0 : i32
    %2 = arith.minsi %1, %c0_i32 : i32
    %c0_i32_0 = arith.constant 0 : i32
    %c0_i32_1 = arith.constant 0 : i32
    %c0_i32_2 = arith.constant 0 : i32
    return %arg0, %c0_i32_0, %2, %c0_i32_1 : i32, i32, i32, i32
  }
  func.func @transform_2(%arg0: i32, %arg1: i32, %arg2: i32) -> (i32, i32, i32, i32) {
    %c0_i32 = arith.constant 0 : i32
    %c0_i32_0 = arith.constant 0 : i32
    %c0_i32_1 = arith.constant 0 : i32
    return %arg0, %arg1, %c0_i32, %c0_i32_0 : i32, i32, i32, i32
  }
}

</mosaic_0001>

<bundles_post_ra>
// kernel: tpu_custom_call.1
= control target key start
LH: loop header
LB: loop body
LE: loop exit
PB: predicated region body
PF: predicated region fallthrough
CT: control target
= control target key end

     0   :  { %7 = vsyncpa [#allocation5], 0  ;;  %s1069_s0 = inlined_call_operand.hbm [shape: f32[2,4,1,256], index: 0, kind: input, shape index: {}]   ;;  %s1070_s1 = inlined_call_operand.hbm [shape: f32[2,4,1,256], index: 1, kind: input, shape index: {}]   ;;  %s1071_s2 = inlined_call_operand.hbm [shape: f32[2,1,8,128], index: 2, kind: output, shape index: {}]  }
   0x1   :  { %9 = vsyncpa [#allocation5 + $0x1], 0 }
   0x2   :  { %10 = vsyncpa [#allocation8], 0 }
   0x3   :  { %12 = vsyncpa [#allocation8 + $0x1], 0 }
   0x4   :  { %13 = vsyncpa [#allocation6], 0 }
   0x5   :  { %15 = vsyncpa [#allocation6 + $0x1], 0  ;;  %s836_s9 = smov 0   ;;  %s838_s10 = smov 0  }
   0x6   :  { %s840_s11 = smov 0   ;;  %s842_s12 = smov 0  }
   0x7   :  { %s844_s13 = smov 0   ;;  %s846_s14 = smov 0  }
   0x8 LB: > { %s572_s15 = sadd.s32 4294967295, %s815_s14   ;;  %s573_s16 = sadd.s32 4294967294, %s815_s14   ;;  %s815_s14 = sphi %s846_s14, %s21_s14   ;;  %s811_s13 = sphi %s844_s13, %s1093_s13   ;;  %s807_s12 = sphi %s842_s12, %s1092_s12   ;;  %s803_s11 = sphi %s840_s11, %s1091_s11   ;;  %s799_s10 = sphi %s838_s10, %s1090_s10   ;;  %s795_s9 = sphi %s836_s9, %s1089_s9  }
   0x9   : > { %s40_s17 = sadd.s32 1, %s811_s13  ;;  %s55_s18 = sadd.s32 1, %s803_s11 }
   0xa   : > { %p42_p0 = scmp.ge.s32.totalorder %s40_s17, 2  ;;  %p62_p1 = scmp.ne.s32.totalorder %s803_s11, %s799_s10 }
   0xb   : > { %p63_p2 = scmp.eq.s32.totalorder %s815_s14, 0  ;;  %p68_p3 = scmp.ne.s32.totalorder %s799_s10, %s795_s9 }
   0xc   : > { %s1095_s17 = smov (%p42_p0, %s40_s17), 0  ;;  %p69_p5 = scmp.eq.s32.totalorder %s572_s15, 0 }
   0xd   : > { %p877_p4 = por %p63_p2, %p62_p1  ;;  %s50_s20 = ssub.s32 %s811_s13, %s1095_s17 }
   0xe   : > { %p128_p6 = scmp.eq.s32.totalorder %s572_s15, 1  ;;  %p53_p7 = scmp.eq.s32.totalorder %s50_s20, 0 }
   0xf   : > { %p883_p8 = por %p69_p5, %p68_p3  ;;  %p134_p10 = scmp.eq.s32.totalorder %s573_s16, 1 }
  0x10   : > { %p887_p9 = por %p128_p6, %p62_p1  ;;  %p614_p13 = scmp.lt.s32.totalorder %s815_s14, 2 }
  0x11   : > { %s1075_s21 = scalar_select %p883_p8, 1, 0 }
  0x12   : > { %s1076_s22 = scalar_select %p887_p9, 1, 0 }
  0x13   : > { %s892_s23 = scalar_select %p53_p7, %s803_s11, %s55_s18  }
  0x14   : > { %p894_p11 = por %p134_p10, %p68_p3  ;;  %s901_s25 = sand.u32 1, %s803_s11  }
  0x15   : > { %s576_s26 = sshll.u32 %s901_s25, 1  ;;  %s591_s27 = sshll.u32 %s811_s13, 7 }
  0x16   : > { %s1077_s24 = scalar_select %p894_p11, 1, 0 }
  0x17   : > { %s910_s30 = scalar_lea.hbm %s1069_s0, %s591_s27  ;;  %s158_s3 = scalar_lea.vmem [#allocation4], %s576_s26 }
  0x18   : > { %s171_s4 = sshll.u32 %s158_s3, 4  ;;  %p918_p0 = pnand %p614_p13, %p877_p4  ;;  %s914_s4 = int_to_ptr.vmem [resolvable:$true] %s171_s4 }
  0x19   : > { %s155_s6 = scalar_lea.sflag [#allocation5], %s901_s25  ;;  %s669_s7 = scalar_lea.hbm %s910_s30, 32 }
  0x1a   : > { %p670_p3 = scmp.ne.s32.totalorder %s910_s30, %s669_s7  ;;  %p671_p5 = pneg %p918_p0 }
  0x1b   : > { %s674_s16 = scalar_lea.hbm %s1069_s0, 256  ;;  %p675_p4 = scmp.lt.u32.totalorder %s910_s30, %s1069_s0 }
  0x1c   : > { %p672_p6 = pnand %p671_p5, %p670_p3  ;;  %p676_p10 = scmp.lt.u32.totalorder %s674_s16, %s669_s7 }
  0x1d   : > { %p678_p12 = scmp.lt.u32.totalorder %s669_s7, %s910_s30 }
  0x1e   : > { %p673_p7 = pneg %p672_p6  ;;  %p677_p13 = por %p676_p10, %p675_p4 }
  0x20   : > { %p679_p1 = por %p678_p12, %p677_p13 }
  0x22   : > { %p680_p2 = pnand %p679_p1, %p673_p7 }
  0x24   : > { %683 = shalt.err (!%p680_p2)
}
  0x25   : > { %s684_s20 = scalar_lea.vmem %s914_s4, 32  ;;  %s817_s28 = smov [#allocation4]  }
  0x26   : > { %p685_p3 = scmp.ne.s32.totalorder %s914_s4, %s684_s20  ;;  %s689_s29 = sshll.u32 %s817_s28, 4  ;;  %s690_s29 = int_to_ptr.vmem [resolvable:$false] %s689_s29 }
  0x27   : > { %s691_s3 = scalar_lea.vmem %s690_s29, 64  ;;  %p692_p9 = scmp.lt.s32.totalorder %s914_s4, %s690_s29 }
  0x28   : > { %p687_p6 = pnand %p685_p3, %p671_p5  ;;  %p693_p4 = scmp.lt.s32.totalorder %s691_s3, %s684_s20 }
  0x2a   : > { %p688_p11 = pneg %p687_p6  ;;  %p694_p10 = por %p693_p4, %p692_p9 }
  0x2c   : > { %p695_p12 = pnand %p694_p10, %p688_p11 }
  0x2e   : > { %698 = shalt.err (!%p695_p12)
}
  0x2f   : > { %606 = dma.hbm_to_vmem [thread:$0]  (!%p918_p0), %s910_s30, 32, %s914_s4, %s155_s6  }
  0x30   : > { %p1079_p1 = scmp.lt.s32.totalorder %s815_s14, 3  ;;  %p1080_p2 = scmp.ge.s32.totalorder %s815_s14, 1 }
  0x31   : > { %s963_s16 = scalar_lea.hbm %s1070_s1, %s591_s27  ;;  %s182_s18 = scalar_lea.vmem [#allocation7], %s576_s26 }
  0x32   : > { %p954_p7 = pnand %p1080_p2, %p1079_p1  ;;  %s195_s19 = sshll.u32 %s182_s18, 4  ;;  %s196_s19 = int_to_ptr.vmem [resolvable:$true] %s195_s19 }
  0x33   : > { %s179_s30 = scalar_lea.sflag [#allocation8], %s901_s25  ;;  %s699_s4 = scalar_lea.hbm %s963_s16, 32 }
  0x34   : > { %s1081_s7 = scalar_select %p954_p7, 1, 0 }
  0x35   : > { %p700_p9 = scmp.ne.s32.totalorder %s963_s16, %s699_s4  ;;  %s704_s27 = scalar_lea.hbm %s1070_s1, 256 }
  0x36   : > { %p705_p3 = scmp.lt.u32.totalorder %s963_s16, %s1070_s1  ;;  %p706_p6 = scmp.lt.u32.totalorder %s704_s27, %s699_s4 }
  0x37   : > { %p702_p11 = pnand %p700_p9, %p671_p5  ;;  %p708_p10 = scmp.lt.u32.totalorder %s699_s4, %s963_s16 }
  0x38   : > { %p707_p4 = por %p706_p6, %p705_p3 }
  0x39   : > { %p703_p13 = pneg %p702_p11 }
  0x3a   : > { %p709_p12 = por %p708_p10, %p707_p4 }
  0x3c   : > { %p710_p1 = pnand %p709_p12, %p703_p13 }
  0x3e   : > { %713 = shalt.err (!%p710_p1)
}
  0x3f   : > { %s714_s25 = scalar_lea.vmem %s196_s19, 32  ;;  %s818_s26 = smov [#allocation7]  }
  0x40   : > { %p715_p2 = scmp.ne.s32.totalorder %s196_s19, %s714_s25  ;;  %s719_s3 = sshll.u32 %s818_s26, 4  ;;  %s720_s3 = int_to_ptr.vmem [resolvable:$false] %s719_s3 }
  0x41   : > { %s721_s8 = scalar_lea.vmem %s720_s3, 64  ;;  %p722_p8 = scmp.lt.s32.totalorder %s196_s19, %s720_s3 }
  0x42   : > { %p717_p9 = pnand %p715_p2, %p671_p5  ;;  %p723_p7 = scmp.lt.s32.totalorder %s721_s8, %s714_s25 }
  0x44   : > { %p718_p11 = pneg %p717_p9  ;;  %p724_p3 = por %p723_p7, %p722_p8 }
  0x46   : > { %p725_p6 = pnand %p724_p3, %p718_p11 }
  0x48   : > { %728 = shalt.err (!%p725_p6)
}
  0x49   : > { %609 = dma.hbm_to_vmem [thread:$0]  (!%p918_p0), %s963_s16, 32, %s196_s19, %s179_s30  }
  0x4a   : > { %p1082_p13 = scmp.ne.s32.totalorder %s1081_s7, 0 }
  0x4b   : > { %s990_s15 = sand.u32 (!%p1082_p13), 1, %s799_s10   ;;  %p1083_p5 = scmp.ne.s32.totalorder (!%p1082_p13), %s1075_s21, 0 }
  0x4c   : > { %204 = sbr.rel (%p1082_p13) target bundleno = 354 (0x162), region = 28  ;;  %s583_s18 = sshll.u32 (!%p1082_p13), %s990_s15, 1 }
  0x4d   : > { %s207_s4 = scalar_lea.sflag (!%p1082_p13), [#allocation5], %s990_s15  ;;  %s210_s6 = scalar_lea.vmem (!%p1082_p13), [#allocation4], %s583_s18 }
  0x53   : > { %782 = dma.done.wait (%p1083_p5), %s207_s4, 32  }
  0x54   : > { %784 = vsyncadd (%p1083_p5), %s207_s4, 4294967264  ;;  %s216_s5 = scalar_lea.sflag [#allocation8], %s990_s15  ;;  %s219_s16 = scalar_lea.vmem [#allocation7], %s583_s18 }
  0x55   : > { %786 = dma.done.wait (%p1083_p5), %s216_s5, 32  }
  0x56   : > { %788 = vsyncadd (%p1083_p5), %s216_s5, 4294967264  ;;  %v255_v0 = vlaneseq  ;;  %v819_v2 = vmov 0.0   ;;  %v261_v3 = vld [vmem:[%s210_s6] sm:$0x3]  ;;  %v268_v7 = vld [vmem:[%s219_s16] sm:$0x3] }
  0x57   : > { %v586_v4 = vmul.f32 -1.442695, %v261_v3  ;;  %vm395_vm1 = vcmask 1040384   ;;  %s585_s21 = sshll.u32 %s990_s15, 3  ;;  %s588_s19 = sshll.u32 %s807_s12, 7 }
  0x58   : > { %vm1003_vm0 = vcmp.lt.s32.totalorder %v255_v0, 256  ;;  %v386_v15 = vshrl.u32 %v255_v0, 7  ;;  %v435_v44 = vand.u32 127, %v255_v0  ;;  %s244_s30 = scalar_lea.vmem [#allocation9], %s585_s21  ;;  %s1020_s25 = scalar_lea.hbm %s1071_s2, %s588_s19 }
  0x59   : > { %259 = vst.msk [vmem:[#allocation2] sm:$0x3] %vm1003_vm0, %v819_v2  ;;  %260 = vst.msk [vmem:[#allocation3] sm:$0x3] %vm1003_vm0, %v819_v2  ;;  %665 = vpow2.f32 %v586_v4  ;;  %s461_s20 = sshll.u32 %s244_s30, 4  ;;  %s447_s26 = scalar_lea.sflag [#allocation6], %s990_s15  ;;  %s1022_s20 = int_to_ptr.vmem [resolvable:$true] %s461_s20 }
  0x5a   : > { %v387_v16 = vsub.s32 0, %v386_v15  ;;  %v391_v17 = vsub.s32 1, %v386_v15  ;;  %vm436_vm2 = vcmp.eq.s32.totalorder %v386_v15, 0  ;;  %vm437_vm3 = vcmp.eq.s32.totalorder %v435_v44, 0  ;;  %s729_s12 = scalar_lea.vmem %s1022_s20, 128  ;;  %p1086_p0 = scmp.ne.s32.totalorder %s1076_s22, 0 }
  0x5b   : > { %vm441_vm4 = vcmp.eq.s32.totalorder %v435_v44, 1  ;;  %vm438_vm5 = vmand %vm436_vm2, %vm437_vm3  ;;  %p730_p8 = scmp.ne.s32.totalorder %s1022_s20, %s729_s12  ;;  %s820_s3 = smov [#allocation9]  }
  0x5c   : > { %vm442_vm6 = vmand %vm436_vm2, %vm441_vm4  ;;  %s733_s8 = sshll.u32 %s820_s3, 4  ;;  %s734_s8 = int_to_ptr.vmem [resolvable:$false] %s733_s8 }
  0x5d   : > { %p731_p7 = pnand %p730_p8, %p1086_p0  ;;  %s735_s18 = scalar_lea.vmem %s734_s8, 256 }
  0x5e   : > { %p736_p10 = scmp.lt.s32.totalorder %s1022_s20, %s734_s8  ;;  %p737_p12 = scmp.lt.s32.totalorder %s735_s18, %s729_s12 }
  0x5f   : > { %p732_p4 = pneg %p731_p7 }
  0x60   : > { %v278_v9 = vld [vmem:[#allocation2] sm:$0x3]  ;;  %v285_v10 = vld [vmem:[#allocation3] sm:$0x3]  ;;  %p738_p1 = por %p737_p12, %p736_p10 }
  0x62   : > { %p739_p2 = pnand %p738_p1, %p732_p4 }
  0x63   : > { %v666_v5 = vpop.eup %665 }
  0x64   : > { %v265_v6 = vadd.f32 1.0, %v666_v5 }
  0x66   : > { %667 = vrcp.f32 %v265_v6 }
  0x70   : > { %v668_v8 = vpop.eup %667 }
  0x71   : > { %v276_v11 = vmul.f32 %v668_v8, %v268_v7  ;;  %v277_v12 = vadd.f32 %v668_v8, %v268_v7 }
  0x73   : > { %v279_v13 = vadd.f32 %v278_v9, %v276_v11  ;;  %v286_v14 = vadd.f32 %v285_v10, %v277_v12 }
  0x75   : > { %284 = vst.msk [vmem:[#allocation2] sm:$0x3] %vm1003_vm0, %v279_v13  ;;  %287 = vst.msk [vmem:[#allocation3] sm:$0x3] %vm1003_vm0, %v286_v14 }
  0x7c   : > { %v383_v18 = vld [vmem:[#allocation2] sm:$0x3]  ;;  %v408_v19 = vld [vmem:[#allocation3] sm:$0x3] }
  0x7d   : > { %v388_v20 = vrot.slane %v383_v18, %v387_v16  ;;  %v392_v21 = vrot.slane %v383_v18, %v391_v17  ;;  %v413_v22 = vrot.slane %v408_v19, %v387_v16  ;;  %v417_v23 = vrot.slane %v408_v19, %v391_v17 }
  0x7f   : > { %v396_v24 = vsel %vm395_vm1, %v388_v20, 0.0  ;;  %v397_v25 = vsel %vm395_vm1, %v392_v21, 0.0  ;;  %v420_v26 = vsel %vm395_vm1, %v413_v22, 0.0  ;;  %v421_v27 = vsel %vm395_vm1, %v417_v23, 0.0 }
  0x80   : > { %v398_v28 = vadd.f32 %v397_v25, %v396_v24  ;;  %v422_v29 = vadd.f32 %v421_v27, %v420_v26 }
  0x82   : > { %399 = vadd.xlane.f32.xlu0 %v398_v28 }
  0x86   : > { %423 = vadd.xlane.f32.xlu0 %v422_v29 }
 0x10f   : > { %v400_v30 = vpop.xlane.xlu0 %399 }
 0x110   : > { %v401_v31 = vrot.slane %v400_v30, 4 }
 0x112   : > { %v402_v32 = vadd.f32 %v401_v31, %v400_v30 }
 0x113   : > { %v424_v33 = vpop.xlane.xlu0 %423 }
 0x114   : > { %v403_v34 = vrot.slane %v402_v32, 2  ;;  %v425_v35 = vrot.slane %v424_v33, 4 }
 0x116   : > { %v426_v36 = vadd.f32 %v425_v35, %v424_v33  ;;  %v404_v37 = vadd.f32 %v403_v34, %v402_v32 }
 0x118   : > { %v427_v38 = vrot.slane %v426_v36, 2  ;;  %v405_v39 = vrot.slane %v404_v37, 1 }
 0x11a   : > { %v428_v40 = vadd.f32 %v427_v38, %v426_v36  ;;  %v406_v41 = vadd.f32 %v405_v39, %v404_v37 }
 0x11c   : > { %593 = vpush %v406_v41  ;;  %v429_v42 = vrot.slane %v428_v40, 1 }
 0x11e   : > { %v430_v43 = vadd.f32 %v429_v42, %v428_v40 }
 0x120   : > { %595 = vpush %v430_v43 }
 0x14d   : > { %s594_s7 = spop %593 }
 0x14e   : > { %v439_v45 = vstv %s594_s7 }
 0x14f   : > { %v440_v46 = vsel %vm438_vm5, %v439_v45, 0.0 }
 0x151   : > { %s596_s27 = spop %595 }
 0x152   : > { %v443_v47 = vstv %s596_s27 }
 0x153   : > { %v444_v48 = vsel %vm442_vm6, %v443_v47, %v440_v46 }
 0x154   : > { %445 = vst [vmem:[%s244_s30] sm:$0xff] %v444_v48 }
 0x155   : > { %742 = shalt.err (!%p739_p2)
}
 0x156   : > { %s743_s15 = scalar_lea.hbm %s1020_s25, 128  ;;  %s747_s5 = scalar_lea.hbm %s1071_s2, 256 }
 0x157   : > { %p744_p9 = scmp.ne.s32.totalorder %s1020_s25, %s743_s15  ;;  %p748_p6 = scmp.lt.u32.totalorder %s1020_s25, %s1071_s2 }
 0x158   : > { %p749_p13 = scmp.lt.u32.totalorder %s747_s5, %s743_s15  ;;  %p751_p8 = scmp.lt.u32.totalorder %s743_s15, %s1020_s25 }
 0x159   : > { %p745_p11 = pnand %p744_p9, %p1086_p0 }
 0x15a   : > { %p750_p5 = por %p749_p13, %p748_p6 }
 0x15b   : > { %p746_p3 = pneg %p745_p11 }
 0x15c   : > { %p752_p7 = por %p751_p8, %p750_p5 }
 0x15e   : > { %p753_p4 = pnand %p752_p7, %p746_p3 }
 0x160   : > { %756 = shalt.err (!%p753_p4)
}
 0x161   : > { %601 = dma.vmem_to_hbm [thread:$0]  (%p1086_p0), %s1022_s20, 128, %s1020_s25, %s447_s26  }
 0x162 PF: > { %s473_s7 = sand.u32 1, %s795_s9   ;;  %p1087_p10 = scmp.ne.s32.totalorder %s1077_s24, 0 }
 0x163   : > { %p1088_p12 = scmp.ge.s32.totalorder %s815_s14, 2  ;;  %s474_s19 = scalar_lea.sflag [#allocation6], %s473_s7 }
 0x165   : > { %p611_p1 = pnand %p1088_p12, %p1087_p10 }
 0x167   : > { %790 = dma.done.wait (!%p611_p1), %s474_s19, 128  }
 0x168   : > { %792 = vsyncadd (!%p611_p1), %s474_s19, 4294967168  ;;  %s21_s14 = sadd.s32 1, %s815_s14   ;;  %s1089_s9 = smov %s799_s10 }
 0x169   : > { %p18_p2 = scmp.ge.s32.totalorder %s21_s14, 4   ;;  %s1090_s10 = smov %s803_s11 }
 0x16a   : > { %s1091_s11 = smov %s892_s23  ;;  %s1092_s12 = smov %s811_s13 }
 0x16b   : > { %s1093_s13 = smov %s1095_s17  ;;  %20 = sbr.rel (!%p18_p2) target bundleno = 8 (0x8), region = 102 }
 0x172   :  { %479 = vsyncpa [#allocation5], 1 }
 0x173   :  { %481 = vsyncpa [#allocation5 + $0x1], 1 }
 0x174   :  { %482 = vsyncpa [#allocation8], 1 }
 0x175   :  { %484 = vsyncpa [#allocation8 + $0x1], 1 }
 0x176   :  { %485 = vsyncpa [#allocation6], 1 }
 0x177   :  { %487 = vsyncpa [#allocation6 + $0x1], 1 }

</bundles_post_ra>
